<compile_context>
chip_gen: v7x
topology: tpu7x:2x2x1
jax: 0.10.0
libtpu: 0.0.40
codegen_flags: <defaults>
</compile_context>

<pallas_src>
import math

import jax
import jax.numpy as jnp
from jax.experimental import pallas as pl
from jax.experimental.pallas import tpu as pltpu


def _round_up(x, m):
    return (x + m - 1) // m * m


def _fused_out_tiling(RC, H):
    """Chunk size tn (multiple of 128) and lane-padded fused width Npad."""
    n0 = RC + H
    tn = min(512, _round_up(n0, 128))
    npad = _round_up(n0, tn)
    return tn, npad


def time_conditioning_kernel(
    time_ref,     # (bb, 1)        f32
    freqw2_ref,   # (1, 2*half)    f32   [w | w] * 2pi  (2pi pre-folded)
    phase_ref,    # (1, 2*half)    f32   [0 | pi/2]     -> sin block | cos block
    w1t_ref,      # (1, H)         f32   W1 row multiplying raw t
    w1sc_ref,     # (2*half, H)    bf16  W1 rows for [sin | cos]
    b1_ref,       # (1, H)         f32
    b2_ref,       # (1, tn)        f32   chunk of [btok | bcond | 0-pad]
    w2_ref,       # (H, tn)        bf16  chunk of [Wtok | Wcond | 0-pad]
    out_ref,      # (bb, tn)       f32   chunk of [tokens | t_cond | 0-pad]
    h_scratch,    # (bb, H)        f32   persists across the N (chunk) axis
):
    # First layer + Swish: compute once per batch tile, reuse for every chunk.
    @pl.when(pl.program_id(1) == 0)
    def _():
        t = time_ref[...]                                       # (bb, 1) f32
        # Learned sinusoidal embedding [sin | cos] as a single EUP pass
        # (cos folded in via the +pi/2 phase) -- no in-kernel lane concat.
        sc = jnp.sin(t * freqw2_ref[...] + phase_ref[...])      # (bb, 2*half)
        h = (
            jnp.dot(sc.astype(jnp.bfloat16), w1sc_ref[...],
                    preferred_element_type=jnp.float32)
            + t * w1t_ref[...]
            + b1_ref[...]
        )                                                        # (bb, H) f32
        h_scratch[...] = h * jax.nn.sigmoid(h)                   # Swish

    # Second layer: one MXU dot per streamed W2 chunk, lane-dense f32 store.
    out_ref[...] = (
        jnp.dot(h_scratch[...].astype(jnp.bfloat16), w2_ref[...],
                preferred_element_type=jnp.float32)
        + b2_ref[...]
    )


def time_conditioning(time, params, *, dim, cond_dim, num_time_tokens):
    B = time.shape[0]
    H = dim * 4
    RC = cond_dim * num_time_tokens
    half2 = params["freqw2"].shape[1]              # 2 * half
    tn, Npad = _fused_out_tiling(RC, H)
    assert params["w2"].shape == (H, Npad) and Npad % tn == 0

    bb = min(B, 256)                               # batch tile
    gb = pl.cdiv(B, bb)
    gn = Npad // tn
    Bp = gb * bb

    t_in = jnp.zeros((Bp, 1), jnp.float32).at[:B, 0].set(
        time.astype(jnp.float32))

    # VMEM budget from the actual block shapes (double-buffered blocks + the
    # persistent h scratch), with 2x headroom for compiler temps / layout pad.
    vmem_need = (
        2 * (bb * 1 * 4)                   # time block
        + 2 * (2 * half2 * 4)              # freqw2 + phase
        + 2 * (2 * H * 4)                  # w1t + b1
        + 2 * (half2 * H * 2)              # w1sc (bf16)
        + 2 * (tn * 4)                     # b2 chunk
        + 2 * (H * tn * 2)                 # w2 chunk (bf16)
        + 2 * (bb * tn * 4)                # out chunk
        + bb * H * 4                       # h scratch
    )
    vmem_limit = int(min(96 * 1024 * 1024,
                         max(4 * 1024 * 1024, 2 * vmem_need)))

    def const(shape):                      # grid-invariant small param block
        return pl.BlockSpec(shape, lambda i, n: (0, 0))

    out = pl.pallas_call(
        time_conditioning_kernel,
        out_shape=jax.ShapeDtypeStruct((Bp, Npad), jnp.float32),
        grid_spec=pltpu.PrefetchScalarGridSpec(
            num_scalar_prefetch=0,
            grid=(gb, gn),
            in_specs=[
                pl.BlockSpec((bb, 1), lambda i, n: (i, 0)),     # time
                const((1, half2)),                              # freqw2
                const((1, half2)),                              # phase
                const((1, H)),                                  # w1t (f32)
                const((half2, H)),                              # w1 sin|cos (bf16)
                const((1, H)),                                  # b1
                pl.BlockSpec((1, tn), lambda i, n: (0, n)),     # b2 chunk
                pl.BlockSpec((H, tn), lambda i, n: (0, n)),     # w2 chunk (bf16)
            ],
            out_specs=pl.BlockSpec((bb, tn), lambda i, n: (i, n)),
            scratch_shapes=[pltpu.VMEM((bb, H), jnp.float32)],  # cached h
        ),
        compiler_params=pltpu.CompilerParams(
            # Batch axis "parallel" (v7x megacore splits batch tiles); the N
            # axis must be "arbitrary": the h scratch carries across it and
            # n == 0 must run first for each batch tile.
            dimension_semantics=("parallel", "arbitrary"),
            vmem_limit_bytes=vmem_limit,
        ),
    )(
        t_in,
        params["freqw2"], params["phase"], params["w1t"], params["w1sc"],
        params["b1"], params["b2"], params["w2"],
    )

    time_tokens = out[:B, :RC].reshape(B, num_time_tokens, cond_dim)
    t_cond = out[:B, RC:RC + H]
    return time_tokens, t_cond


def init_params(key, *, dim, cond_dim, time_embedding_dim, num_time_tokens):
    H = dim * 4
    half = time_embedding_dim // 2
    E1 = time_embedding_dim + 1            # concat([t, sin, cos]) width
    RC = cond_dim * num_time_tokens
    ks = jax.random.split(key, 8)

    def q(x):  # master weights exactly bf16-representable (kernel streams bf16)
        return x.astype(jnp.bfloat16).astype(jnp.float32)

    # --- Module-layout (f32) parameters: used by the pure-JAX reference. ---
    freqw = jax.random.normal(ks[0], (1, half), jnp.float32)             # learned freqs
    w1    = q(jax.random.normal(ks[1], (E1, H), jnp.float32) * 0.05)     # Linear(E+1, 4d)
    b1    = jax.random.normal(ks[2], (1, H), jnp.float32) * 0.05
    wcond = q(jax.random.normal(ks[3], (H, H), jnp.float32) * 0.05)      # Linear(4d, 4d)
    bcond = jax.random.normal(ks[4], (1, H), jnp.float32) * 0.05
    wtok  = q(jax.random.normal(ks[5], (H, RC), jnp.float32) * 0.05)     # Linear(4d, RC)
    btok  = jax.random.normal(ks[6], (1, RC), jnp.float32) * 0.05

    # --- Kernel-layout (packed / fused / bf16 / lane-padded) parameters. ---
    freqw2 = jnp.tile(freqw, (1, 2)) * (2.0 * math.pi)                   # [w|w] * 2pi
    phase = jnp.concatenate(
        [jnp.zeros((1, half), jnp.float32),
         jnp.full((1, half), 0.5 * math.pi, jnp.float32)], axis=1)       # sin | cos

    tn, Npad = _fused_out_tiling(RC, H)
    n0 = RC + H
    w2 = jnp.concatenate([wtok, wcond], axis=1)                          # (H, RC+H)
    b2 = jnp.concatenate([btok, bcond], axis=1)                          # (1, RC+H)
    w2 = jnp.pad(w2, ((0, 0), (0, Npad - n0)))                           # lane-dense pad
    b2 = jnp.pad(b2, ((0, 0), (0, Npad - n0)))

    return {
        # kernel params
        "freqw2": freqw2,
        "phase":  phase,
        "w1t":    w1[0:1, :],                       # f32 row for raw t
        "w1sc":   w1[1:, :].astype(jnp.bfloat16),   # [sin rows; cos rows]
        "b1":     b1,
        "w2":     w2.astype(jnp.bfloat16),          # [Wtok | Wcond | 0-pad]
        "b2":     b2,
        # reference (module-layout, f32) params
        "ref_freqw": freqw, "ref_w1": w1, "ref_b1": b1,
        "ref_wtok": wtok, "ref_btok": btok, "ref_wcond": wcond, "ref_bcond": bcond,
    }


def reference(time, params, *, dim, cond_dim, num_time_tokens):
    """Pure-JAX f32 replica of the PyTorch module's forward pass."""
    B = time.shape[0]
    t = time.reshape(B, 1).astype(jnp.float32)
    freqs = t * params["ref_freqw"] * (2.0 * math.pi)
    emb = jnp.concatenate([t, jnp.sin(freqs), jnp.cos(freqs)], axis=-1)   # (B, E+1)
    h = emb @ params["ref_w1"] + params["ref_b1"]
    h = h * jax.nn.sigmoid(h)                                             # Swish
    tok = (h @ params["ref_wtok"] + params["ref_btok"]).reshape(
        B, num_time_tokens, cond_dim)
    t_cond = h @ params["ref_wcond"] + params["ref_bcond"]
    return tok, t_cond


if __name__ == "__main__":
    dim, cond_dim = 8, 16
    time_embedding_dim, num_time_tokens = 16, 2
    B = 8

    key = jax.random.PRNGKey(0)
    k_param, k_time = jax.random.split(key)
    params = init_params(
        k_param, dim=dim, cond_dim=cond_dim,
        time_embedding_dim=time_embedding_dim, num_time_tokens=num_time_tokens,
    )
    time_in = jax.random.uniform(k_time, (B,), jnp.float32)   # normalized timestep

    tok, t_cond = time_conditioning(
        time_in, params, dim=dim, cond_dim=cond_dim, num_time_tokens=num_time_tokens
    )
    jax.block_until_ready((tok, t_cond))

    tok_ref, t_ref = reference(
        time_in, params, dim=dim, cond_dim=cond_dim, num_time_tokens=num_time_tokens
    )
    assert tok.shape == (B, num_time_tokens, cond_dim)
    assert t_cond.shape == (B, dim * 4)
    # Tolerance covers the bf16 activation casts feeding the MXU (weights are
    # bf16-representable by construction, so they match the f32 reference exactly).
    assert jnp.allclose(tok, tok_ref, atol=2e-2, rtol=2e-2), \
        float(jnp.max(jnp.abs(tok - tok_ref)))
    assert jnp.allclose(t_cond, t_ref, atol=2e-2, rtol=2e-2), \
        float(jnp.max(jnp.abs(t_cond - t_ref)))

    print("KERNEL_OK")
</pallas_src>

<mosaic_0001>
module attributes {stable_mosaic.version = 11 : i64} {
  func.func @time_conditioning_kernel(%arg0: i32, %arg1: i32, %arg2: memref<8x1xf32, #tpu.memory_space<vmem>>, %arg3: memref<1x16xf32, #tpu.memory_space<vmem>>, %arg4: memref<1x16xf32, #tpu.memory_space<vmem>>, %arg5: memref<1x32xf32, #tpu.memory_space<vmem>>, %arg6: memref<16x32xbf16, #tpu.memory_space<vmem>>, %arg7: memref<1x32xf32, #tpu.memory_space<vmem>>, %arg8: memref<1x128xf32, #tpu.memory_space<vmem>>, %arg9: memref<32x128xbf16, #tpu.memory_space<vmem>>, %arg10: memref<8x128xf32, #tpu.memory_space<vmem>>, %arg11: memref<8x32xf32, #tpu.memory_space<vmem>>) attributes {dimension_semantics = [#tpu.dimension_semantics<parallel>, #tpu.dimension_semantics<arbitrary>], iteration_bounds = array<i64: 1, 1>, scalar_prefetch = 0 : i64, scratch_operands = 1 : i64, tpu.core_type = #tpu.core_type<tc>, window_params = [{transform_indices = @transform_0, window_bounds = array<i64: 8, 1>}, {pipeline_mode = #tpu.pipeline_mode<synchronous>, transform_indices = @transform_1, window_bounds = array<i64: 1, 16>}, {pipeline_mode = #tpu.pipeline_mode<synchronous>, transform_indices = @transform_2, window_bounds = array<i64: 1, 16>}, {pipeline_mode = #tpu.pipeline_mode<synchronous>, transform_indices = @transform_3, window_bounds = array<i64: 1, 32>}, {pipeline_mode = #tpu.pipeline_mode<synchronous>, transform_indices = @transform_4, window_bounds = array<i64: 16, 32>}, {pipeline_mode = #tpu.pipeline_mode<synchronous>, transform_indices = @transform_5, window_bounds = array<i64: 1, 32>}, {transform_indices = @transform_6, window_bounds = array<i64: 1, 128>}, {transform_indices = @transform_7, window_bounds = array<i64: 32, 128>}, {transform_indices = @transform_8, window_bounds = array<i64: 8, 128>}]} {
    %c0_i32 = arith.constant 0 : i32
    %0 = arith.cmpi eq, %arg1, %c0_i32 : i32
    %1 = arith.extui %0 : i1 to i32
    %c0_i32_0 = arith.constant 0 : i32
    %2 = arith.cmpi ne, %1, %c0_i32_0 : i32
    scf.if %2 {
      %c0_8 = arith.constant 0 : index
      %c0_9 = arith.constant 0 : index
      %11 = vector.load %arg2[%c0_8, %c0_9] : memref<8x1xf32, #tpu.memory_space<vmem>>, vector<8x1xf32>
      %c0_10 = arith.constant 0 : index
      %c0_11 = arith.constant 0 : index
      %12 = vector.load %arg3[%c0_10, %c0_11] : memref<1x16xf32, #tpu.memory_space<vmem>>, vector<1x16xf32>
      %13 = vector.broadcast %11 : vector<8x1xf32> to vector<8x16xf32>
      %14 = vector.broadcast %12 : vector<1x16xf32> to vector<8x16xf32>
      %15 = arith.mulf %13, %14 : vector<8x16xf32>
      %c0_12 = arith.constant 0 : index
      %c0_13 = arith.constant 0 : index
      %16 = vector.load %arg4[%c0_12, %c0_13] : memref<1x16xf32, #tpu.memory_space<vmem>>, vector<1x16xf32>
      %17 = vector.broadcast %16 : vector<1x16xf32> to vector<8x16xf32>
      %18 = arith.addf %15, %17 : vector<8x16xf32>
      %19 = math.sin %18 : vector<8x16xf32>
      %20 = arith.truncf %19 : vector<8x16xf32> to vector<8x16xbf16>
      %c0_14 = arith.constant 0 : index
      %c0_15 = arith.constant 0 : index
      %21 = vector.load %arg6[%c0_14, %c0_15] : memref<16x32xbf16, #tpu.memory_space<vmem>>, vector<16x32xbf16>
      %cst_16 = arith.constant dense<0.000000e+00> : vector<8x32xf32>
      %22 = tpu.matmul %20, %21, %cst_16 {dimension_numbers = #tpu.dot_dimension_numbers<[1], [0], [0], [1], [0, 0, 1, 1], [], []>} : vector<8x16xbf16>, vector<16x32xbf16>, vector<8x32xf32> -> vector<8x32xf32>
      %c0_17 = arith.constant 0 : index
      %c0_18 = arith.constant 0 : index
      %23 = vector.load %arg5[%c0_17, %c0_18] : memref<1x32xf32, #tpu.memory_space<vmem>>, vector<1x32xf32>
      %24 = vector.broadcast %11 : vector<8x1xf32> to vector<8x32xf32>
      %25 = vector.broadcast %23 : vector<1x32xf32> to vector<8x32xf32>
      %26 = arith.mulf %24, %25 : vector<8x32xf32>
      %27 = arith.addf %22, %26 : vector<8x32xf32>
      %c0_19 = arith.constant 0 : index
      %c0_20 = arith.constant 0 : index
      %28 = vector.load %arg7[%c0_19, %c0_20] : memref<1x32xf32, #tpu.memory_space<vmem>>, vector<1x32xf32>
      %29 = vector.broadcast %28 : vector<1x32xf32> to vector<8x32xf32>
      %30 = arith.addf %27, %29 : vector<8x32xf32>
      %31 = arith.negf %30 : vector<8x32xf32>
      %32 = math.exp %31 : vector<8x32xf32>
      %cst_21 = arith.constant 1.000000e+00 : f32
      %33 = vector.broadcast %cst_21 : f32 to vector<8x32xf32>
      %34 = arith.addf %33, %32 : vector<8x32xf32>
      %35 = arith.divf %33, %34 : vector<8x32xf32>
      %36 = arith.mulf %30, %35 : vector<8x32xf32>
      %c0_22 = arith.constant 0 : index
      %c0_23 = arith.constant 0 : index
      %37 = vector.load %arg11[%c0_22, %c0_23] : memref<8x32xf32, #tpu.memory_space<vmem>>, vector<8x32xf32>
      tpu.vector_store %arg11[%c0_22, %c0_23], %36 {strides = array<i32>} : memref<8x32xf32, #tpu.memory_space<vmem>>, vector<8x32xf32>,
    } else {
    }
    %c0 = arith.constant 0 : index
    %c0_1 = arith.constant 0 : index
    %3 = vector.load %arg11[%c0, %c0_1] : memref<8x32xf32, #tpu.memory_space<vmem>>, vector<8x32xf32>
    %4 = arith.truncf %3 : vector<8x32xf32> to vector<8x32xbf16>
    %c0_2 = arith.constant 0 : index
    %c0_3 = arith.constant 0 : index
    %5 = vector.load %arg9[%c0_2, %c0_3] : memref<32x128xbf16, #tpu.memory_space<vmem>>, vector<32x128xbf16>
    %cst = arith.constant dense<0.000000e+00> : vector<8x128xf32>
    %6 = tpu.matmul %4, %5, %cst {dimension_numbers = #tpu.dot_dimension_numbers<[1], [0], [0], [1], [0, 0, 1, 1], [], []>} : vector<8x32xbf16>, vector<32x128xbf16>, vector<8x128xf32> -> vector<8x128xf32>
    %c0_4 = arith.constant 0 : index
    %c0_5 = arith.constant 0 : index
    %7 = vector.load %arg8[%c0_4, %c0_5] : memref<1x128xf32, #tpu.memory_space<vmem>>, vector<1x128xf32>
    %8 = vector.broadcast %7 : vector<1x128xf32> to vector<8x128xf32>
    %9 = arith.addf %6, %8 : vector<8x128xf32>
    %c0_6 = arith.constant 0 : index
    %c0_7 = arith.constant 0 : index
    %10 = vector.load %arg10[%c0_6, %c0_7] : memref<8x128xf32, #tpu.memory_space<vmem>>, vector<8x128xf32>
    tpu.vector_store %arg10[%c0_6, %c0_7], %9 {strides = array<i32>} : memref<8x128xf32, #tpu.memory_space<vmem>>, vector<8x128xf32>,
    return
  }
  func.func @transform_0(%arg0: i32, %arg1: i32) -> (i32, i32) {
    %c0_i32 = arith.constant 0 : i32
    %c0_i32_0 = arith.constant 0 : i32
    return %arg0, %c0_i32 : i32, i32
  }
  func.func @transform_1(%arg0: i32, %arg1: i32) -> (i32, i32) {
    %c0_i32 = arith.constant 0 : i32
    %c0_i32_0 = arith.constant 0 : i32
    %c0_i32_1 = arith.constant 0 : i32
    return %c0_i32, %c0_i32_0 : i32, i32
  }
  func.func @transform_2(%arg0: i32, %arg1: i32) -> (i32, i32) {
    %c0_i32 = arith.constant 0 : i32
    %c0_i32_0 = arith.constant 0 : i32
    %c0_i32_1 = arith.constant 0 : i32
    return %c0_i32, %c0_i32_0 : i32, i32
  }
  func.func @transform_3(%arg0: i32, %arg1: i32) -> (i32, i32) {
    %c0_i32 = arith.constant 0 : i32
    %c0_i32_0 = arith.constant 0 : i32
    %c0_i32_1 = arith.constant 0 : i32
    return %c0_i32, %c0_i32_0 : i32, i32
  }
  func.func @transform_4(%arg0: i32, %arg1: i32) -> (i32, i32) {
    %c0_i32 = arith.constant 0 : i32
    %c0_i32_0 = arith.constant 0 : i32
    %c0_i32_1 = arith.constant 0 : i32
    return %c0_i32, %c0_i32_0 : i32, i32
  }
  func.func @transform_5(%arg0: i32, %arg1: i32) -> (i32, i32) {
    %c0_i32 = arith.constant 0 : i32
    %c0_i32_0 = arith.constant 0 : i32
    %c0_i32_1 = arith.constant 0 : i32
    return %c0_i32, %c0_i32_0 : i32, i32
  }
  func.func @transform_6(%arg0: i32, %arg1: i32) -> (i32, i32) {
    %c0_i32 = arith.constant 0 : i32
    %c0_i32_0 = arith.constant 0 : i32
    return %c0_i32, %arg1 : i32, i32
  }
  func.func @transform_7(%arg0: i32, %arg1: i32) -> (i32, i32) {
    %c0_i32 = arith.constant 0 : i32
    %c0_i32_0 = arith.constant 0 : i32
    return %c0_i32, %arg1 : i32, i32
  }
  func.func @transform_8(%arg0: i32, %arg1: i32) -> (i32, i32) {
    %c0_i32 = arith.constant 0 : i32
    return %arg0, %arg1 : i32, i32
  }
}

</mosaic_0001>

<bundles_post_ra>
// kernel: tpu_custom_call.1
= control target key start
LH: loop header
LB: loop body
LE: loop exit
PB: predicated region body
PF: predicated region fallthrough
CT: control target
= control target key end

     0   :  { %v407_v1 = vmov 0   ;;  %s531_s0 = inlined_call_operand.vmem [shape: f32[8,1], index: 0, kind: input, shape index: {}]   ;;  %s532_s1 = inlined_call_operand.vmem [shape: f32[1,16], index: 1, kind: input, shape index: {}]   ;;  %s533_s2 = inlined_call_operand.vmem [shape: f32[1,16], index: 2, kind: input, shape index: {}]   ;;  %s534_s3 = inlined_call_operand.vmem [shape: f32[1,32], index: 3, kind: input, shape index: {}]   ;;  %s535_s4 = inlined_call_operand.vmem [shape: bf16[16,32], index: 4, kind: input, shape index: {}]   ;;  %s536_s5 = inlined_call_operand.vmem [shape: f32[1,32], index: 5, kind: input, shape index: {}]   ;;  %s537_s6 = inlined_call_operand.vmem [shape: f32[1,128], index: 6, kind: input, shape index: {}]   ;;  %s538_s7 = inlined_call_operand.vmem [shape: bf16[32,128], index: 7, kind: input, shape index: {}]   ;;  %s539_s8 = inlined_call_operand.hbm [shape: f32[8,128], index: 8, kind: output, shape index: {}]  }
   0x1   :  { %v35_v0 = vld [vmem:[%s531_s0] sm:$0xff]  ;;  %371 = vset.pattern.permute.xlu0 %v407_v1 }
   0x2   :  { %39 = vperm.xlu0 %371, %v35_v0  }
   0x3   :  { %13 = vsyncpa [#allocation4], 0  ;;  %v372_v2 = vld [vmem:[%s535_s4] sm:$0xff]   ;;  %v408_v3 = vmov 0.0   ;;  %vm409_vm0 = vmmov 0   ;;  %vm178_vm14 = vcmask 130048  }
   0x4   :  { %343 = vmatprep.subr.bf16.mxu0 %v408_v3  ;;  %345 = vmatprep.mubr.msk.bf16.mxu0 %vm409_vm0, %v408_v3  ;;  %v323_v4 = vld [vmem:[%s532_s1] ss:$0 sm:$0xff]  ;;  %v410_v19 = vmov 683565275   ;;  %v411_v21 = vmov 2475754826  }
   0x5   :  { %344 = vmatpush3.bf16.msra.mxu0 %v372_v2  ;;  %349 = vmatprep.subr.bf16.mxu1 %v408_v3  ;;  %v324_v5 = vld [vmem:[%s533_s2] ss:$0 sm:$0xff]  ;;  %v412_v24 = vmov 2131351028   ;;  %v413_v27 = vmov 2102212464  }
   0x6   :  { %353 = vmatprep.mubr.msk.bf16.mxu1 %vm409_vm0, %v408_v3  ;;  %v414_v30 = vmov 920167782   ;;  %v415_v33 = vmov 1326507024   ;;  %vm237_vm15 = vcmask 261120  }
  0x81   :  { %v478_v6 = vpop.permute.xlu0 %39 }
  0x82   :  { %v48_v7 = vmul.f32 %v323_v4, %v478_v6 }
  0x84   :  { %v481_v8 = vadd.f32 %v324_v5, %v48_v7 }
  0x86   :  { %v60_v9 = vand.u32 2139095040, %v481_v8  ;;  %v57_v13 = vand.u32 2147483647, %v481_v8  ;;  %vm59_vm8 = vcmp.lt.s32.totalorder %v481_v8, 0  ;;  %vm149_vm13 = vweird.f32 %v481_v8 }
  0x88   :  { %v61_v10 = vshrl.u32 %v60_v9, 23  ;;  %v64_v16 = vand.u32 8388607, %v57_v13  ;;  %vm58_vm9 = vcmp.le.f32.partialorder %v57_v13, 0.7853982 }
  0x8a   :  { %v325_v11 = vadd.s32 4294967169, %v61_v10  ;;  %v65_v35 = vor.u32 8388608, %v64_v16 }
  0x8c   :  { %v67_v12 = vadd.s32 1, %v325_v11  ;;  %v105_v49 = vshll.u32 %v65_v35, 8 }
  0x8e   :  { %vm68_vm1 = vcmp.gt.s32.totalorder %v67_v12, 0 }
  0x8f   :  { %v69_v14 = vsel %vm68_vm1, %v67_v12, 0 }
  0x90   :  { %v71_v15 = vand.u32 31, %v69_v14  ;;  %v70_v18 = vshrl.u32 %v69_v14, 5 }
  0x92   :  { %v72_v17 = vsub.s32 32, %v71_v15  ;;  %v74_v20 = vshll.u32 %v410_v19, %v71_v15  ;;  %v77_v22 = vshll.u32 %v411_v21, %v71_v15  ;;  %v80_v26 = vshll.u32 %v412_v24, %v71_v15 }
  0x93   :  { %v83_v29 = vshll.u32 %v413_v27, %v71_v15  ;;  %v86_v32 = vshll.u32 %v414_v30, %v71_v15  ;;  %vm89_vm2 = vcmp.lt.s32.totalorder %v70_v18, 1  ;;  %vm92_vm3 = vcmp.lt.s32.totalorder %v70_v18, 4 }
  0x94   :  { %v75_v23 = vshrl.u32 %v411_v21, %v72_v17  ;;  %v78_v25 = vshrl.u32 %v412_v24, %v72_v17  ;;  %v81_v28 = vshrl.u32 %v413_v27, %v72_v17  ;;  %v84_v31 = vshrl.u32 %v414_v30, %v72_v17 }
  0x95   :  { %v87_v34 = vshrl.u32 %v415_v33, %v72_v17  ;;  %v73_v44 = vshrl.u32 %v410_v19, %v72_v17  ;;  %vm91_vm4 = vcmp.lt.s32.totalorder %v70_v18, 3  ;;  %vm90_vm5 = vcmp.lt.s32.totalorder %v70_v18, 2 }
  0x96   :  { %v76_v36 = vor.u32 %v75_v23, %v74_v20  ;;  %v79_v37 = vor.u32 %v78_v25, %v77_v22  ;;  %v82_v38 = vor.u32 %v81_v28, %v80_v26  ;;  %v85_v39 = vor.u32 %v84_v31, %v83_v29 }
  0x97   :  { %v88_v40 = vor.u32 %v87_v34, %v86_v32 }
  0x98   :  { %v94_v41 = vsel %vm92_vm3, %v82_v38, 2102212464  ;;  %v97_v42 = vsel %vm89_vm2, %v76_v36, %v79_v37  ;;  %v101_v43 = vsel %vm89_vm2, %v79_v37, %v82_v38  ;;  %v98_v45 = vsel %vm92_vm3, %v85_v39, 920167782 }
  0x99   :  { %v102_v46 = vsel %vm92_vm3, %v88_v40, 1326507024  ;;  %v99_v47 = vsel %vm91_vm4, %v82_v38, %v98_v45  ;;  %v93_v50 = vsel %vm89_vm2, %v73_v44, %v76_v36  ;;  %v95_v51 = vsel %vm91_vm4, %v79_v37, %v94_v41  ;;  %v373_v40 = vld [vmem:[%s538_s7] sm:$0xff]   ;;  %v374_v41 = vld [vmem:[%s538_s7 + $0x8] sm:$0xff]  }
  0x9a   :  { %v103_v48 = vsel %vm91_vm4, %v85_v39, %v102_v46  ;;  %v100_v52 = vsel %vm90_vm5, %v97_v42, %v99_v47  ;;  %v96_v58 = vsel %vm90_vm5, %v93_v50, %v95_v51  ;;  %350 = vmatpush3.bf16.msra.mxu1 %v373_v40  ;;  %v332_v44 = vld [vmem:[%s536_s5] ss:$0 sm:$0xff]  ;;  %s416_s5 = smov [#allocation3]  }
  0x9b   :  { %v104_v53 = vsel %vm90_vm5, %v101_v43, %v103_v48  ;;  %v490_v56 = vmul.u32.u64.low %v105_v49, %v100_v52  ;;  %v491_v57 = vmul.u32.u64.high %v105_v49, %v100_v52, %v490_v56  ;;  %v112_v60 = vmul.u32 %v105_v49, %v96_v58  ;;  %351 = vmatprep.subr.bf16.mxu1 %v408_v3  ;;  %s315_s17 = sshll.u32 %s416_s5, 4  ;;  %s316_s17 = int_to_ptr.vmem [resolvable:$true] %s315_s17 }
  0x9c   :  { %v487_v54 = vmul.u32.u64.low %v105_v49, %v104_v53  ;;  %v488_v55 = vmul.u32.u64.high %v105_v49, %v104_v53, %v487_v54  ;;  %s383_s18 = scalar_lea.vmem %s316_s17, 128  ;;  %p388_p1 = scmp.lt.s32.totalorder %s316_s17, %s316_s17 }
  0x9d   :  { %v115_v59 = vadd.s32 1, %v491_v57  ;;  %p384_p0 = scmp.ne.s32.totalorder %s316_s17, %s383_s18  ;;  %p389_p2 = scmp.lt.s32.totalorder %s383_s18, %s383_s18 }
  0x9e   :  { %vm114_vm6 = vc.u32 %v488_v55, %v490_v56  ;;  %v113_v11 = vadd.s32 %v490_v56, %v488_v55  ;;  %352 = vmatpush3.bf16.msra.mxu1 %v374_v41  ;;  %v334_v55 = vld [vmem:[%s537_s6] ss:$0 sm:$0xff] }
  0x9f   :  { %v116_v61 = vsel %vm114_vm6, %v115_v59, %v491_v57  ;;  %p390_p3 = por %p389_p2, %p388_p1 }
  0xa0   :  { %v117_v62 = vadd.s32 %v116_v61, %v112_v60 }
  0xa1   :  { %p391_p4 = pnand %p390_p3, %p384_p0 }
  0xa2   :  { %v118_v63 = vadd.s32 536870912, %v117_v62 }
  0xa4   :  { %v119_v0 = vshrl.u32 %v118_v63, 30 }
  0xa6   :  { %v120_v1 = vshll.u32 %v119_v0, 30  ;;  %v143_v24 = vsub.s32 4, %v119_v0 }
  0xa8   :  { %v121_v2 = vsub.s32 %v117_v62, %v120_v1  ;;  %v144_v27 = vsel %vm59_vm8, %v143_v24, %v119_v0 }
  0xa9   :  { %v146_v29 = vsel %vm58_vm9, 0, %v144_v27 }
  0xaa   :  { %v123_v4 = vsub.s32 0, %v121_v2  ;;  %v150_v30 = vadd.s32 3, %v146_v29 }
  0xac   :  { %v326_v5 = vmin.u32 %v123_v4, %v121_v2  ;;  %v151_v31 = vand.u32 3, %v150_v30 }
  0xae   :  { %v125_v7 = vclz %v326_v5  ;;  %vm156_vm10 = vcmp.eq.s32.totalorder %v151_v31, 2  ;;  %vm153_vm11 = vcmp.eq.s32.totalorder %v151_v31, 0  ;;  %vm152_vm12 = vcmp.lt.s32.totalorder %v151_v31, 2 }
  0xb0   :  { %v327_v9 = vadd.s32 4294967294, %v125_v7 }
  0xb2   :  { %vm328_vm7 = vcmp.lt.s32.totalorder %v327_v9, 0 }
  0xb3   :  { %v128_v10 = vsel %vm328_vm7, 0, %v327_v9 }
  0xb4   :  { %v129_v12 = vsub.s32 32, %v128_v10  ;;  %v133_v14 = vsub.s32 4294967266, %v128_v10  ;;  %v130_v15 = vshll.u32 %v121_v2, %v128_v10 }
  0xb6   :  { %v131_v16 = vshrl.u32 %v113_v11, %v129_v12  ;;  %v134_v17 = vadd.s32 127, %v133_v14 }
  0xb8   :  { %v132_v18 = vor.u32 %v131_v16, %v130_v15  ;;  %v135_v19 = vshll.u32 %v134_v17, 23 }
  0xba   :  { %v136_v20 = vor.u32 4788187, %v135_v19  ;;  %v139_v22 = vcvt.s32.f32 %v132_v18 }
  0xbc   :  { %v137_v21 = vand.u32 2147483647, %v136_v20 }
  0xbe   :  { %v140_v23 = vmul.f32 %v139_v22, %v137_v21 }
  0xc0   :  { %v141_v25 = vxor.u32 2147483648, %v140_v23 }
  0xc2   :  { %v142_v26 = vsel %vm59_vm8, %v141_v25, %v140_v23 }
  0xc3   :  { %v145_v28 = vsel %vm58_vm9, %v481_v8, %v142_v26  ;;  %v329_v8 = vld [vmem:[%s534_s3] ss:$0 sm:$0xff] }
  0xc4   :  { %375 = vcosq.f32 %v145_v28  ;;  %v171_v42 = vmul.f32 %v329_v8, %v478_v6 }
  0xc5   :  { %377 = vsinq.f32 %v145_v28 }
  0xce   :  { %v376_v32 = vpop.eup %375 }
  0xcf   :  { %v378_v33 = vpop.eup %377  ;;  %v157_v34 = vxor.u32 2147483648, %v376_v32 }
  0xd0   :  { %v154_v35 = vxor.u32 2147483648, %v378_v33 }
  0xd1   :  { %v158_v36 = vsel %vm156_vm10, %v157_v34, %v378_v33 }
  0xd2   :  { %v155_v37 = vsel %vm153_vm11, %v376_v32, %v154_v35 }
  0xd3   :  { %v159_v13 = vsel %vm152_vm12, %v155_v37, %v158_v36 }
  0xd4   :  { %v160_v38 = vsel %vm149_vm13, nan, %v159_v13 }
  0xd5   :  { %v161_v39 = vpack.c.bf16 %v160_v38, %v160_v38 }
  0xd7   :  { %346 = vmatmul.mubr.msk.bf16.vlgmr.msra.gmra.mrb[0].mxu0 %vm178_vm14, %v161_v39 }
 0x1aa   :  { %v216_v43 = vpop.f32.mrb[0].mxu0 }
 0x1ab   :  { %v217_v45 = vadd.f32 %v216_v43, %v171_v42  ;;  %v347_v46 = vpop.f32.mrb[1].mxu0 }
 0x1ac   :  { %v219_v47 = vpop.f32.mrb[2].mxu0 }
 0x1ad   :  { %v229_v48 = vadd.f32 %v332_v44, %v217_v45  ;;  %v348_v49 = vpop.f32.mrb[3].mxu0 }
 0x1af   :  { %v333_v50 = vmul.f32 -1.442695, %v229_v48 }
 0x1b1   :  { %379 = vpow2.f32 %v333_v50 }
 0x1bb   :  { %v380_v3 = vpop.eup %379 }
 0x1bc   :  { %v233_v51 = vadd.f32 1.0, %v380_v3 }
 0x1be   :  { %381 = vrcp.f32 %v233_v51 }
 0x1c8   :  { %v382_v52 = vpop.eup %381 }
 0x1c9   :  { %v236_v53 = vmul.f32 %v382_v52, %v229_v48 }
 0x1cb   :  { %238 = vst.msk [vmem:[#allocation2] sm:$0xff] %vm237_vm15, %v236_v53 }
 0x1d2   :  { %v239_v6 = vld [vmem:[#allocation2] sm:$0xff] }
 0x1d3   :  { %v240_v54 = vpack.c.bf16 %v239_v6, %v239_v6 }
 0x1d5   :  { %354 = vmatmul.mubr.msk.bf16.vlgmr.msra.gmra.mrb[0].mxu1 %vm237_vm15, %v240_v54 }
 0x2a8   :  { %v302_v56 = vpop.f32.mrb[0].mxu1 }
 0x2a9   :  { %v303_v57 = vadd.f32 %v334_v55, %v302_v56  ;;  %v355_v58 = vpop.f32.mrb[1].mxu1 }
 0x2aa   :  { %v305_v59 = vpop.f32.mrb[2].mxu1 }
 0x2ab   :  { %308 = vst [vmem:[#allocation3] sm:$0xff] %v303_v57  ;;  %v356_v60 = vpop.f32.mrb[3].mxu1 }
 0x2ac   :  { %394 = shalt.err (!%p391_p4)
}
 0x2ad   :  { %s395_s6 = scalar_lea.hbm %s539_s8, 128 }
 0x2ae   :  { %p396_p5 = scmp.ne.s32.totalorder %s539_s8, %s395_s6  ;;  %p399_p6 = scmp.lt.u32.totalorder %s395_s6, %s539_s8 }
 0x2b0   :  { %p401_p7 = pnand %p399_p6, %p396_p5 }
 0x2b2   :  { %404 = shalt.err (!%p401_p7)
}
 0x2b3   :  { %318 = dma.vmem_to_hbm [thread:$0]  %s316_s17, 128, %s539_s8, [#allocation4]  }
 0x2b4   :  { %405 = dma.done.wait [#allocation4], 128  }
 0x2b5   :  { %406 = vsyncadd [#allocation4], 4294967168 }
 0x2b6   :  { %322 = vsyncpa [#allocation4], 1 }

</bundles_post_ra>
